<compile_context>
chip_gen: v6e
topology: v6e:2x2x1
jax: 0.10.0
libtpu: 0.0.40
codegen_flags: <defaults>
</compile_context>

<pallas_src>
from functools import partial

import jax
import jax.numpy as jnp
from jax.experimental import pallas as pl
from jax.experimental.pallas import tpu as pltpu

HEAD_LANES = 8  # lanes 0-1: policy probs, lane 2: value, lanes 3-7: zero pad


def actor_critic_kernel(x_ref, w1_ref, b1_ref, wh_ref, bh_ref, out_ref):
    # x_ref : [bt, 4]            batch tile of observations
    # w1_ref: [4, 128]           fc weight (stored [in, out])
    # b1_ref: [1, 128]           fc bias
    # wh_ref: [128, 8]           fused head weight (cols 0-1 policy, col 2 value)
    # bh_ref: [1, 8]             fused head bias
    # out_ref:[bt, 8]            lanes 0-1 = softmax policy, lane 2 = value

    # fc: Linear(4,128) + ReLU (bias as a cheap VPU broadcast add).
    h = jnp.dot(x_ref[...], w1_ref[...], preferred_element_type=jnp.float32)
    h = jnp.maximum(h + b1_ref[...], 0.0)                          # [bt, 128]

    # Fused policy+value heads: one narrow MXU matmul -> [bt, 8].
    y = jnp.dot(h, wh_ref[...], preferred_element_type=jnp.float32) + bh_ref[...]

    # 2-class softmax in closed form (no cross-lane reductions):
    #   p0 = sigmoid(logit0 - logit1), p1 = 1 - p0  (exactly normalized).
    d = y[:, 0:1] - y[:, 1:2]                                       # [bt, 1]
    p0 = pl.reciprocal(1.0 + jnp.exp(-d), approx=False)
    p1 = 1.0 - p0

    # Assemble the 8-lane output: lane0=p0, lane1=p1, lane2=value (rest = y = 0).
    lane = jax.lax.broadcasted_iota(jnp.int32, y.shape, dimension=1)
    out_ref[...] = jnp.where(lane == 0, p0, jnp.where(lane == 1, p1, y))


def _round_up(n, m):
    return (n + m - 1) // m * m


def pack_params(w1, b1, w2, b2, w3, b3):
    """One-time packing of static weights (call at init, not per step).

    Weights stored as [in, out] (transposed vs. torch's [out, in]).
    Returns (w1, b1, wh, bh) ready for actor_critic_forward.
    """
    H = w1.shape[1]
    b1 = jnp.asarray(b1, jnp.float32).reshape(1, H)
    wh = (jnp.zeros((H, HEAD_LANES), jnp.float32)
          .at[:, 0:2].set(jnp.asarray(w2, jnp.float32))
          .at[:, 2:3].set(jnp.asarray(w3, jnp.float32)))
    bh = (jnp.zeros((1, HEAD_LANES), jnp.float32)
          .at[:, 0:2].set(jnp.asarray(b2, jnp.float32).reshape(1, 2))
          .at[:, 2:3].set(jnp.asarray(b3, jnp.float32).reshape(1, 1)))
    return jnp.asarray(w1, jnp.float32), b1, wh, bh


@partial(jax.jit, static_argnames=("batch_tile",))
def actor_critic_forward(x, w1, b1, wh, bh, *, batch_tile=1024):
    """x: [B, 4]; (w1, b1, wh, bh) from pack_params. Returns (policy, value)."""
    B, K = x.shape
    H = w1.shape[1]

    # Batch tile: sublane-aligned, big enough to amortize per-step overhead,
    # but keep >=4 grid steps when B is large so v7x's 2 TCs both get work.
    bp8 = _round_up(B, 8)
    bt = min(int(batch_tile), max(8, _round_up(pl.cdiv(bp8, 4), 8)))
    Bp = _round_up(B, bt)
    if Bp != B:
        x = jnp.concatenate([x, jnp.zeros((Bp - B, K), x.dtype)], axis=0)

    cost = pl.CostEstimate(
        flops=2 * Bp * K * H + 2 * Bp * H * HEAD_LANES,
        transcendentals=Bp,
        bytes_accessed=4 * (Bp * K + Bp * HEAD_LANES
                            + K * H + H + H * HEAD_LANES + HEAD_LANES),
    )

    out = pl.pallas_call(
        actor_critic_kernel,
        out_shape=jax.ShapeDtypeStruct((Bp, HEAD_LANES), jnp.float32),
        grid=(Bp // bt,),
        in_specs=[
            pl.BlockSpec((bt, K), lambda i: (i, 0)),           # x tiles over batch
            pl.BlockSpec((K, H), lambda i: (0, 0)),            # weights stay resident
            pl.BlockSpec((1, H), lambda i: (0, 0)),
            pl.BlockSpec((H, HEAD_LANES), lambda i: (0, 0)),
            pl.BlockSpec((1, HEAD_LANES), lambda i: (0, 0)),
        ],
        out_specs=pl.BlockSpec((bt, HEAD_LANES), lambda i: (i, 0)),
        compiler_params=pltpu.CompilerParams(
            dimension_semantics=("parallel",)),
        cost_estimate=cost,
    )(x, w1, b1, wh, bh)

    policy = out[:B, 0:2]
    value = out[:B, 2:3]
    return policy, value


def init_linear(key, fan_in, fan_out):
    # Matches PyTorch nn.Linear default: U(-1/sqrt(fan_in), 1/sqrt(fan_in)).
    kw, kb = jax.random.split(key)
    bound = 1.0 / jnp.sqrt(float(fan_in))
    # Stored as [in, out] (transposed vs. torch's [out, in]) for x @ W.
    w = jax.random.uniform(kw, (fan_in, fan_out), jnp.float32, -bound, bound)
    b = jax.random.uniform(kb, (1, fan_out), jnp.float32, -bound, bound)
    return w, b


if __name__ == "__main__":
    key = jax.random.PRNGKey(0)
    k_x, k_fc, k_pi, k_v = jax.random.split(key, 4)

    B = 8
    x = jax.random.normal(k_x, (B, 4), jnp.float32)

    w1, b1 = init_linear(k_fc, 4, 128)
    w2, b2 = init_linear(k_pi, 128, 2)
    w3, b3 = init_linear(k_v, 128, 1)

    # One-time static packing (hoisted out of the per-step forward).
    pw1, pb1, pwh, pbh = pack_params(w1, b1, w2, b2, w3, b3)

    policy, value = actor_critic_forward(x, pw1, pb1, pwh, pbh)
    jax.block_until_ready((policy, value))

    # Pure-JAX reference check.
    h_ref = jnp.maximum(x @ w1 + b1, 0.0)
    logits_ref = h_ref @ w2 + b2
    policy_ref = jax.nn.softmax(logits_ref, axis=1)
    value_ref = h_ref @ w3 + b3
    assert policy.shape == (B, 2) and value.shape == (B, 1)
    assert jnp.allclose(policy, policy_ref, atol=1e-5)
    assert jnp.allclose(value, value_ref, atol=1e-5)
    assert jnp.allclose(policy.sum(axis=1), 1.0, atol=1e-6)  # exact normalization

    print("KERNEL_OK")
</pallas_src>

<mosaic_0001>
module attributes {stable_mosaic.version = 11 : i64} {
  func.func @actor_critic_kernel(%arg0: i32, %arg1: memref<8x4xf32, #tpu.memory_space<vmem>>, %arg2: memref<4x128xf32, #tpu.memory_space<vmem>>, %arg3: memref<1x128xf32, #tpu.memory_space<vmem>>, %arg4: memref<128x8xf32, #tpu.memory_space<vmem>>, %arg5: memref<1x8xf32, #tpu.memory_space<vmem>>, %arg6: memref<8x8xf32, #tpu.memory_space<vmem>>) attributes {dimension_semantics = [#tpu.dimension_semantics<parallel>], iteration_bounds = array<i64: 1>, scalar_prefetch = 0 : i64, scratch_operands = 0 : i64, tpu.core_type = #tpu.core_type<tc>, window_params = [{transform_indices = @transform_0, window_bounds = array<i64: 8, 4>}, {pipeline_mode = #tpu.pipeline_mode<synchronous>, transform_indices = @transform_1, window_bounds = array<i64: 4, 128>}, {pipeline_mode = #tpu.pipeline_mode<synchronous>, transform_indices = @transform_2, window_bounds = array<i64: 1, 128>}, {pipeline_mode = #tpu.pipeline_mode<synchronous>, transform_indices = @transform_3, window_bounds = array<i64: 128, 8>}, {pipeline_mode = #tpu.pipeline_mode<synchronous>, transform_indices = @transform_4, window_bounds = array<i64: 1, 8>}, {transform_indices = @transform_5, window_bounds = array<i64: 8, 8>}]} {
    %c0 = arith.constant 0 : index
    %c0_0 = arith.constant 0 : index
    %0 = vector.load %arg1[%c0, %c0_0] : memref<8x4xf32, #tpu.memory_space<vmem>>, vector<8x4xf32>
    %c0_1 = arith.constant 0 : index
    %c0_2 = arith.constant 0 : index
    %1 = vector.load %arg2[%c0_1, %c0_2] : memref<4x128xf32, #tpu.memory_space<vmem>>, vector<4x128xf32>
    %cst = arith.constant dense<0.000000e+00> : vector<8x128xf32>
    %2 = tpu.matmul %0, %1, %cst {dimension_numbers = #tpu.dot_dimension_numbers<[1], [0], [0], [1], [0, 0, 1, 1], [], []>} : vector<8x4xf32>, vector<4x128xf32>, vector<8x128xf32> -> vector<8x128xf32>
    %c0_3 = arith.constant 0 : index
    %c0_4 = arith.constant 0 : index
    %3 = vector.load %arg3[%c0_3, %c0_4] : memref<1x128xf32, #tpu.memory_space<vmem>>, vector<1x128xf32>
    %4 = vector.broadcast %3 : vector<1x128xf32> to vector<8x128xf32>
    %5 = arith.addf %2, %4 : vector<8x128xf32>
    %cst_5 = arith.constant 0.000000e+00 : f32
    %6 = vector.broadcast %cst_5 : f32 to vector<8x128xf32>
    %7 = arith.maximumf %5, %6 : vector<8x128xf32>
    %c0_6 = arith.constant 0 : index
    %c0_7 = arith.constant 0 : index
    %8 = vector.load %arg4[%c0_6, %c0_7] : memref<128x8xf32, #tpu.memory_space<vmem>>, vector<128x8xf32>
    %cst_8 = arith.constant dense<0.000000e+00> : vector<8x8xf32>
    %9 = tpu.matmul %7, %8, %cst_8 {dimension_numbers = #tpu.dot_dimension_numbers<[1], [0], [0], [1], [0, 0, 1, 1], [], []>} : vector<8x128xf32>, vector<128x8xf32>, vector<8x8xf32> -> vector<8x8xf32>
    %c0_9 = arith.constant 0 : index
    %c0_10 = arith.constant 0 : index
    %10 = vector.load %arg5[%c0_9, %c0_10] : memref<1x8xf32, #tpu.memory_space<vmem>>, vector<1x8xf32>
    %11 = vector.broadcast %10 : vector<1x8xf32> to vector<8x8xf32>
    %12 = arith.addf %9, %11 : vector<8x8xf32>
    %13 = vector.extract_strided_slice %12 {offsets = [0, 0], sizes = [8, 1], strides = [1, 1]} : vector<8x8xf32> to vector<8x1xf32>
    %14 = vector.extract_strided_slice %12 {offsets = [0, 1], sizes = [8, 1], strides = [1, 1]} : vector<8x8xf32> to vector<8x1xf32>
    %15 = arith.subf %13, %14 : vector<8x1xf32>
    %cst_11 = arith.constant 0.000000e+00 : f32
    %16 = vector.broadcast %cst_11 : f32 to vector<8x1xf32>
    %17 = arith.subf %16, %15 : vector<8x1xf32>
    %18 = math.exp %17 : vector<8x1xf32>
    %cst_12 = arith.constant 1.000000e+00 : f32
    %19 = vector.broadcast %cst_12 : f32 to vector<8x1xf32>
    %20 = arith.addf %19, %18 : vector<8x1xf32>
    %21 = tpu.reciprocal %20 : vector<8x1xf32> -> vector<8x1xf32>
    %cst_13 = arith.constant 1.000000e+00 : f32
    %22 = vector.broadcast %cst_13 : f32 to vector<8x1xf32>
    %23 = arith.subf %22, %21 : vector<8x1xf32>
    %24 = tpu.iota {dimensions = array<i32: 1>} : vector<8x8xi32>
    %c0_i32 = arith.constant 0 : i32
    %25 = vector.broadcast %c0_i32 : i32 to vector<8x8xi32>
    %26 = arith.cmpi eq, %24, %25 : vector<8x8xi32>
    %c1_i32 = arith.constant 1 : i32
    %27 = vector.broadcast %c1_i32 : i32 to vector<8x8xi32>
    %28 = arith.cmpi eq, %24, %27 : vector<8x8xi32>
    %29 = vector.shape_cast %23 : vector<8x1xf32> to vector<8x1xf32>
    %30 = vector.broadcast %29 : vector<8x1xf32> to vector<8x8xf32>
    %31 = arith.select %28, %30, %12 : vector<8x8xi1>, vector<8x8xf32>
    %32 = vector.shape_cast %21 : vector<8x1xf32> to vector<8x1xf32>
    %33 = vector.broadcast %32 : vector<8x1xf32> to vector<8x8xf32>
    %34 = arith.select %26, %33, %31 : vector<8x8xi1>, vector<8x8xf32>
    %c0_14 = arith.constant 0 : index
    %c0_15 = arith.constant 0 : index
    %35 = vector.load %arg6[%c0_14, %c0_15] : memref<8x8xf32, #tpu.memory_space<vmem>>, vector<8x8xf32>
    tpu.vector_store %arg6[%c0_14, %c0_15], %34 {strides = array<i32>} : memref<8x8xf32, #tpu.memory_space<vmem>>, vector<8x8xf32>,
    return
  }
  func.func @transform_0(%arg0: i32) -> (i32, i32) {
    %c0_i32 = arith.constant 0 : i32
    %c0_i32_0 = arith.constant 0 : i32
    return %arg0, %c0_i32 : i32, i32
  }
  func.func @transform_1(%arg0: i32) -> (i32, i32) {
    %c0_i32 = arith.constant 0 : i32
    %c0_i32_0 = arith.constant 0 : i32
    %c0_i32_1 = arith.constant 0 : i32
    return %c0_i32, %c0_i32_0 : i32, i32
  }
  func.func @transform_2(%arg0: i32) -> (i32, i32) {
    %c0_i32 = arith.constant 0 : i32
    %c0_i32_0 = arith.constant 0 : i32
    %c0_i32_1 = arith.constant 0 : i32
    return %c0_i32, %c0_i32_0 : i32, i32
  }
  func.func @transform_3(%arg0: i32) -> (i32, i32) {
    %c0_i32 = arith.constant 0 : i32
    %c0_i32_0 = arith.constant 0 : i32
    %c0_i32_1 = arith.constant 0 : i32
    return %c0_i32, %c0_i32_0 : i32, i32
  }
  func.func @transform_4(%arg0: i32) -> (i32, i32) {
    %c0_i32 = arith.constant 0 : i32
    %c0_i32_0 = arith.constant 0 : i32
    %c0_i32_1 = arith.constant 0 : i32
    return %c0_i32, %c0_i32_0 : i32, i32
  }
  func.func @transform_5(%arg0: i32) -> (i32, i32) {
    %c0_i32 = arith.constant 0 : i32
    %c0_i32_0 = arith.constant 0 : i32
    return %arg0, %c0_i32 : i32, i32
  }
}

</mosaic_0001>

<bundles_post_ra>
// kernel: actor_critic_forward.1
= control target key start
LH: loop header
LB: loop body
LE: loop exit
PB: predicated region body
PF: predicated region fallthrough
CT: control target
= control target key end

     0   :  { %vm33_vm0 = vcmask 1043456   ;;  %vm29_vm1 = vcmask 31744   ;;  %v307_v0 = vmov 0.0   ;;  %vm308_vm2 = vmmov 0   ;;  %s309_s29 = smov 127   ;;  %s404_s1 = inlined_call_operand.vmem [shape: f32[4,128], index: 1, kind: input, shape index: {}]   ;;  %s405_s0 = inlined_call_operand.vmem [shape: f32[8,4], index: 0, kind: input, shape index: {}]   ;;  %s406_s3 = inlined_call_operand.vmem [shape: f32[128,8], index: 3, kind: input, shape index: {}]   ;;  %s407_s2 = inlined_call_operand.vmem [shape: f32[1,128], index: 2, kind: input, shape index: {}]   ;;  %s408_s4 = inlined_call_operand.vmem [shape: f32[1,8], index: 4, kind: input, shape index: {}]   ;;  %s409_s5 = inlined_call_operand.vmem [shape: f32[8,8], index: 5, kind: output, shape index: {}]  }
   0x1   :  { %257 = vmatprep.subr.mxu0 %v307_v0  ;;  %v21_v1 = vld [vmem:[%s404_s1] sm:$0xf]  ;;  %259 = vmatprep.mubr.msk.f32.mxu0 %vm308_vm2, %v307_v0  ;;  %v123_v3 = vld [vmem:[%s406_s3 + $0x78] sm:$0xff]  ;;  %v122_v4 = vld [vmem:[%s406_s3 + $0x70] sm:$0xff]  ;;  %v310_v28 = vmov 0   ;;  %v212_v37 = vlaneseq  ;;  %vm228_vm5 = vcmask 64512  }
   0x2   :  { %v20_v2 = vld [vmem:[%s405_s0] sm:$0xff]  ;;  %258 = vmatpush3.msk.msra.mxu0 %vm33_vm0, %v21_v1  ;;  %262 = vmatprep.subr.mxu1 %v307_v0  ;;  %v121_v5 = vld [vmem:[%s406_s3 + $0x68] sm:$0xff]  ;;  %v119_v7 = vld [vmem:[%s406_s3 + $0x58] sm:$0xff] }
   0x3   :  { %260 = vmatmul.mubr.msk.f32.vlgmr.msra.gmra.mxu0 %vm29_vm1, %v20_v2  ;;  %263 = vmatpush3.msra.mxu1 %v123_v3  ;;  %v120_v6 = vld [vmem:[%s406_s3 + $0x60] sm:$0xff]  ;;  %v118_v8 = vld [vmem:[%s406_s3 + $0x50] sm:$0xff]  ;;  %v117_v9 = vld [vmem:[%s406_s3 + $0x48] sm:$0xff]  ;;  %v213_v38 = vand.u32 127, %v212_v37 }
   0x4   :  { %264 = vmatprep.subr.mxu1 %v307_v0  ;;  %294 = vmatprep.mubr.msk.f32.mxu1 %vm308_vm2, %v307_v0  ;;  %v116_v10 = vld [vmem:[%s406_s3 + $0x40] sm:$0xff]  ;;  %v115_v11 = vld [vmem:[%s406_s3 + $0x38] sm:$0xff]  ;;  %v114_v12 = vld [vmem:[%s406_s3 + $0x30] sm:$0xff] }
   0x5   :  { %265 = vmatpush3.msra.mxu1 %v122_v4  ;;  %v113_v13 = vld [vmem:[%s406_s3 + $0x28] sm:$0xff]  ;;  %v112_v14 = vld [vmem:[%s406_s3 + $0x20] sm:$0xff]  ;;  %v111_v15 = vld [vmem:[%s406_s3 + $0x18] sm:$0xff]  ;;  %302 = vset.pattern.permute.xlu1 %v310_v28  ;;  %vm215_vm3 = vcmp.eq.s32.totalorder %v213_v38, 1  ;;  %vm214_vm4 = vcmp.eq.s32.totalorder %v213_v38, 0 }
   0x6   :  { %266 = vmatprep.subr.mxu1 %v307_v0  ;;  %v110_v16 = vld [vmem:[%s406_s3 + $0x10] sm:$0xff]  ;;  %v109_v17 = vld [vmem:[%s406_s3 + $0x8] sm:$0xff]  ;;  %v108_v18 = vld [vmem:[%s406_s3] sm:$0xff]  ;;  %301 = vset.pattern.permute.xlu0 %v310_v28 }
   0x7   :  { %267 = vmatpush3.msra.mxu1 %v121_v5  ;;  %v234_v19 = vld [vmem:[%s407_s2] ss:$0 sm:$0xff] }
   0x8   :  { %268 = vmatprep.subr.mxu1 %v307_v0  ;;  %v237_v24 = vld [vmem:[%s408_s4] ss:$0 sm:$0xff] }
   0x9   :  { %269 = vmatpush3.msra.mxu1 %v120_v6 }
   0xa   :  { %270 = vmatprep.subr.mxu1 %v307_v0 }
   0xb   :  { %271 = vmatpush3.msra.mxu1 %v119_v7 }
   0xc   :  { %272 = vmatprep.subr.mxu1 %v307_v0 }
   0xd   :  { %273 = vmatpush3.msra.mxu1 %v118_v8 }
   0xe   :  { %274 = vmatprep.subr.mxu1 %v307_v0 }
   0xf   :  { %275 = vmatpush3.msra.mxu1 %v117_v9 }
  0x10   :  { %276 = vmatprep.subr.mxu1 %v307_v0 }
  0x11   :  { %277 = vmatpush3.msra.mxu1 %v116_v10 }
  0x12   :  { %278 = vmatprep.subr.mxu1 %v307_v0 }
  0x13   :  { %279 = vmatpush3.msra.mxu1 %v115_v11 }
  0x14   :  { %280 = vmatprep.subr.mxu1 %v307_v0 }
  0x15   :  { %281 = vmatpush3.msra.mxu1 %v114_v12 }
  0x16   :  { %282 = vmatprep.subr.mxu1 %v307_v0 }
  0x17   :  { %283 = vmatpush3.msra.mxu1 %v113_v13 }
  0x18   :  { %284 = vmatprep.subr.mxu1 %v307_v0 }
  0x19   :  { %285 = vmatpush3.msra.mxu1 %v112_v14 }
  0x1a   :  { %286 = vmatprep.subr.mxu1 %v307_v0 }
  0x1b   :  { %287 = vmatpush3.msra.mxu1 %v111_v15 }
  0x1c   :  { %288 = vmatprep.subr.mxu1 %v307_v0 }
  0x1d   :  { %289 = vmatpush3.msra.mxu1 %v110_v16 }
  0x1e   :  { %290 = vmatprep.subr.mxu1 %v307_v0 }
  0x1f   :  { %291 = vmatpush3.msra.mxu1 %v109_v17 }
  0x20   :  { %292 = vmatprep.subr.mxu1 %v307_v0 }
  0x21   :  { %293 = vmatpush3.msra.mxu1 %v108_v18 }
  0xc3   :  { %v103_v20 = vpop.f32.mrf.mxu0 }
  0xc4   :  { %v104_v21 = vadd.f32 %v234_v19, %v103_v20 }
  0xc5   :  { %v261_v22 = vpop.f32.mrf.mxu0 }
  0xc6   :  { %v107_v23 = vmax.f32 %v104_v21, 0.0 }
  0xc8   :  { %295 = vmatmul.mubr.f32.vlgmr.msra.gmra.mxu1 %v107_v23 }
 0x188   :  { %v197_v25 = vpop.f32.mrf.mxu1 }
 0x189   :  { %v198_v26 = vadd.f32 %v237_v24, %v197_v25 }
 0x18a   :  { %v296_v27 = vpop.f32.mrf.mxu1 }
 0x18b   :  { %202 = vrot.lane.b32.xlu0 %v198_v26, %s309_s29 }
 0x1fd   :  { %v203_v29 = vpop.permute.xlu0 %202 }
 0x1fe   :  { %v205_v30 = vsub.f32 %v198_v26, %v203_v29 }
 0x200   :  { %v206_v31 = vsub.f32 0.0, %v205_v30 }
 0x202   :  { %v207_v32 = vmul.f32 1.442695, %v206_v31 }
 0x204   :  { %303 = vpow2.f32 %v207_v32 }
 0x211   :  { %v304_v33 = vpop.eup %303 }
 0x212   :  { %v209_v34 = vadd.f32 1.0, %v304_v33 }
 0x214   :  { %305 = vrcp.f32 %v209_v34 }
 0x221   :  { %v306_v35 = vpop.eup %305 }
 0x222   :  { %224 = vperm.xlu1 %302, %v306_v35   ;;  %v211_v36 = vsub.f32 1.0, %v306_v35 }
 0x224   :  { %218 = vperm.xlu0 %301, %v211_v36  }
 0x29d   :  { %v225_v40 = vpop.permute.xlu1 %224 }
 0x29f   :  { %v219_v39 = vpop.permute.xlu0 %218 }
 0x2a0   :  { %v221_v41 = vsel %vm215_vm3, %v219_v39, %v198_v26 }
 0x2a1   :  { %v227_v42 = vsel %vm214_vm4, %v225_v40, %v221_v41 }
 0x2a2   :  { %229 = vst.msk [vmem:[%s409_s5] sm:$0xff] %vm228_vm5, %v227_v42 }

</bundles_post_ra>
